<compile_context>
chip_gen: v7x
topology: tpu7x:2x2x1
jax: 0.10.0
libtpu: 0.0.40
codegen_flags: <defaults>
</compile_context>

<pallas_src>
import jax
import jax.numpy as jnp
import numpy as np
from jax.experimental import pallas as pl
from jax.experimental.pallas import tpu as pltpu

_LANE = 128
_SUBLANE = 16          # bf16 sublane packing; conservative for f32 as well


def conv3x3_relu_kernel(x_ref, halo_ref, w_ref, b_ref, o_ref):
    """One (batch, H-tile) grid step of fused 3x3 conv + bias + ReLU.

    x_ref    : (TH, W+2, Cin)     main rows of the halo window      (VMEM)
    halo_ref : (2,  W+2, Cin)     the 2 rows directly below         (VMEM)
    w_ref    : (3, 3, Cin, Cout)  HWIO weights                      (VMEM)
    b_ref    : (1, Cout)          f32 bias                          (VMEM)
    o_ref    : (TH, W, Cout)      NHWC output tile                  (VMEM)
    """
    TH, W, Cout = o_ref.shape
    Cin = x_ref.shape[-1]

    def shifted(kw):
        # (TH+2, W, Cin) window shifted by kw along W: one sublane-offset copy
        # of the main rows plus a cheap leading-dim append of the 2 halo rows.
        return jnp.concatenate(
            [x_ref[:, kw:kw + W, :], halo_ref[:, kw:kw + W, :]], axis=0)

    acc = None
    if Cin % 128 == 0:
        # Lane-aligned Cin: fold kw into the contraction -> 3 MXU matmuls with
        # K = 3*Cin (full MXU depth on the >=128-channel UNet16 layers).
        patch = jnp.concatenate([shifted(0), shifted(1), shifted(2)], axis=-1)
        for kh in range(3):
            lhs = patch[kh:kh + TH].reshape(TH * W, 3 * Cin)
            rhs = w_ref[kh].reshape(3 * Cin, Cout)       # layout-preserving
            d = jnp.dot(lhs, rhs, preferred_element_type=jnp.float32)
            acc = d if acc is None else acc + d
    else:
        # Lane-unaligned Cin: keep K = Cin, but hoist the W shift out of the kh
        # loop (3 relayouts per tile instead of 9) and sum the taps in SSA so
        # there is no scratch read-modify-write through the vector-store slot.
        for kw in range(3):
            s = shifted(kw)
            for kh in range(3):
                lhs = s[kh:kh + TH].reshape(TH * W, Cin)  # leading-dim slice
                d = jnp.dot(lhs, w_ref[kh, kw],
                            preferred_element_type=jnp.float32)
                acc = d if acc is None else acc + d

    # f32 epilogue: bias + ReLU, layout-preserving reshape to the output block
    # (full channel extent -> no padded FLOPs / padded HBM writeback).
    y = jnp.maximum(acc + b_ref[...], 0.0)
    o_ref[...] = y.reshape(o_ref.shape).astype(o_ref.dtype)


def _round_up(x, m):
    return (x + m - 1) // m * m


def _vmem_capacity_bytes():
    try:
        return int(pltpu.get_tpu_info().vmem_capacity_bytes)
    except Exception:
        return 64 * 2**20           # conservative: v7x per-TensorCore VMEM


def _tile_footprint_bytes(th, W, Cin, Cout, in_bytes, out_bytes):
    """Conservative per-grid-step VMEM footprint (lane/sublane padded)."""
    lane_in, lane_out = _round_up(Cin, _LANE), _round_up(Cout, _LANE)
    sub_wp2, sub_w = _round_up(W + 2, _SUBLANE), _round_up(W, _SUBLANE)
    x_main = 2 * th * sub_wp2 * lane_in * in_bytes           # dbl-buffered rows
    x_halo = 2 * 2 * sub_wp2 * lane_in * in_bytes            # dbl-buffered halo
    wgt = 2 * 9 * _round_up(Cin, _SUBLANE) * lane_out * in_bytes
    out = 2 * th * sub_w * lane_out * out_bytes              # dbl-buffered out
    tmp = 3 * (th + 2) * sub_w * lane_in * in_bytes          # shifted / patch
    acc = 2 * _round_up(th * W, 8) * lane_out * 4            # f32 acc + epilogue
    return x_main + x_halo + wgt + out + tmp + acc


def _pick_tile_h(H, W, Cin, Cout, in_bytes, out_bytes, budget_bytes):
    """Largest tile height (multiple of 8, <= round_up(H, 8)) within budget."""
    max_th = max(8, _round_up(H, 8))
    best, th = 8, 8
    while th <= max_th:
        if _tile_footprint_bytes(th, W, Cin, Cout, in_bytes,
                                 out_bytes) <= budget_bytes:
            best = th
        th += 8
    return best


def conv3x3_relu_nhwc(x_nhwc, w_hwio, bias, *, tile_h=None,
                      compute_dtype=jnp.bfloat16, out_dtype=None):
    """Fused 3x3 conv (padding=1) + bias + ReLU on NHWC input.

    NHWC in / NHWC out.  A full UNet16 port should chain the layers in this
    layout (and in bf16 for inference) so no per-layer transposes are needed.
    compute_dtype=jnp.float32 gives a bit-accurate (training-safe) path.
    """
    N, H, W, Cin = x_nhwc.shape
    KH, KW, Cin_w, Cout = w_hwio.shape
    assert (KH, KW) == (3, 3) and Cin_w == Cin, "kernel expects a 3x3 conv"
    if out_dtype is None:
        out_dtype = x_nhwc.dtype

    in_bytes = jnp.dtype(compute_dtype).itemsize
    out_bytes = jnp.dtype(out_dtype).itemsize

    # Generation-aware tile sizing: target ~30% of this chip's VMEM per step
    # (128 MiB on v5e/v6e -> big tiles; 64 MiB per core on v7x -> smaller).
    cap = _vmem_capacity_bytes()
    budget = int(0.30 * cap)
    if tile_h is None:
        TH = _pick_tile_h(H, W, Cin, Cout, in_bytes, out_bytes, budget)
    else:
        TH = max(2, int(tile_h))
        TH += TH % 2                        # halo BlockSpec needs an even TH
        if _tile_footprint_bytes(TH, W, Cin, Cout, in_bytes,
                                 out_bytes) > int(0.6 * cap):
            # Clamp oversized manual tiles instead of failing to compile (v7x).
            TH = _pick_tile_h(H, W, Cin, Cout, in_bytes, out_bytes, budget)
    assert TH % 2 == 0

    Hp = _round_up(H, TH)                   # pad rows so TH tiles H exactly
    nH = Hp // TH

    # Single fused cast+pad pass; the kernel then reads the activation from HBM
    # exactly once (+ a 2/TH halo re-read) via the pipelined BlockSpecs below.
    x_pad = jnp.pad(x_nhwc.astype(compute_dtype),
                    ((0, 0), (1, 1 + Hp - H), (1, 1), (0, 0)))
    w_c = w_hwio.astype(compute_dtype)                  # (3, 3, Cin, Cout)
    b2d = bias.reshape(1, Cout).astype(jnp.float32)

    fp = _tile_footprint_bytes(TH, W, Cin, Cout, in_bytes, out_bytes)
    vmem_limit = int(min(max(2 * fp, 32 * 2**20), int(0.85 * cap)))

    halo_blk = TH // 2      # 2-row blocks: index (h+1)*TH/2 == row (h+1)*TH

    out_padded = pl.pallas_call(
        conv3x3_relu_kernel,
        out_shape=jax.ShapeDtypeStruct((N, Hp, W, Cout), out_dtype),
        grid=(N, nH),
        in_specs=[
            # Main TH rows of the halo window for tile h.
            pl.BlockSpec((None, TH, W + 2, Cin), lambda n, h: (n, h, 0, 0)),
            # The 2 rows directly below (same array, 2-row blocks). No HBM
            # re-materialization of the activations; ~2/TH extra read only.
            pl.BlockSpec((None, 2, W + 2, Cin),
                         lambda n, h: (n, (h + 1) * halo_blk, 0, 0)),
            # Weights / bias: constant block index -> fetched once, reused.
            pl.BlockSpec((3, 3, Cin, Cout), lambda n, h: (0, 0, 0, 0)),
            pl.BlockSpec((1, Cout), lambda n, h: (0, 0)),
        ],
        out_specs=pl.BlockSpec((None, TH, W, Cout), lambda n, h: (n, h, 0, 0)),
        compiler_params=pltpu.CompilerParams(
            dimension_semantics=("parallel", "parallel"),
            vmem_limit_bytes=vmem_limit,
        ),
    )(x_pad, x_pad, w_c, b2d)

    # Drop only the padded bottom rows (channels are exact).  When chaining
    # UNet16 layers, keep the padded-H NHWC tensor and slice at the output.
    return out_padded[:, :H]


def conv_relu(x_nchw, weight_oihw, bias, **kwargs):
    """PyTorch-facing ConvRelu: NCHW in, NCHW out (matches nn.Conv2d + ReLU).

    NOTE: a full UNet16 port should keep the whole network NHWC so these
    per-layer transposes (full HBM round trips) disappear; they are kept here
    only to match the PyTorch module's NCHW interface.
    """
    x_nhwc = jnp.transpose(x_nchw, (0, 2, 3, 1))
    w_hwio = jnp.transpose(weight_oihw, (2, 3, 1, 0))   # OIHW -> HWIO
    out_nhwc = conv3x3_relu_nhwc(x_nhwc, w_hwio, bias, **kwargs)
    return jnp.transpose(out_nhwc, (0, 3, 1, 2))


def conv_relu_reference(x_nchw, weight_oihw, bias):
    """Plain-JAX reference (same semantics as nn.Conv2d(pad=1) + ReLU)."""
    out = jax.lax.conv_general_dilated(
        x_nchw, weight_oihw, window_strides=(1, 1), padding="SAME",
        dimension_numbers=("NCHW", "OIHW", "NCHW"))
    out = out + bias.reshape(1, -1, 1, 1)
    return jnp.maximum(out, 0.0)


if __name__ == "__main__":
    # ConvRelu(in_size=4, out_size=8) at small NCHW shapes.
    N, Cin, H, W = 2, 4, 16, 16
    Cout, K = 8, 3

    key = jax.random.PRNGKey(0)
    kx, kwt, kb = jax.random.split(key, 3)
    x = jax.random.normal(kx, (N, Cin, H, W), dtype=jnp.float32)
    weight = (jax.random.normal(kwt, (Cout, Cin, K, K), dtype=jnp.float32)
              / np.sqrt(Cin * K * K))
    bias = jax.random.normal(kb, (Cout,), dtype=jnp.float32) * 0.1

    ref = conv_relu_reference(x, weight, bias)

    # 1) f32 compute, non-dividing tile (exercises H padding + multi-tile grid).
    out_f32 = jax.block_until_ready(
        conv_relu(x, weight, bias, tile_h=6, compute_dtype=jnp.float32))
    if not bool(jnp.allclose(out_f32, ref, atol=1e-4, rtol=1e-4)):
        raise AssertionError("f32 Pallas ConvRelu does not match reference")

    # 2) default bf16 MXU path with the hardware-aware auto tile.
    out_bf16 = jax.block_until_ready(conv_relu(x, weight, bias))
    if not bool(jnp.allclose(out_bf16, ref, atol=5e-2, rtol=5e-2)):
        raise AssertionError("bf16 Pallas ConvRelu does not match reference")

    # 3) lane-aligned Cin (128): exercises the folded-K (3-matmul) branch.
    Cin2, Cout2 = 128, 32
    kx2, kw2, kb2 = jax.random.split(jax.random.PRNGKey(0), 3)
    x2 = jax.random.normal(kx2, (1, Cin2, 16, 16), dtype=jnp.float32)
    w2 = (jax.random.normal(kw2, (Cout2, Cin2, K, K), dtype=jnp.float32)
          / np.sqrt(Cin2 * K * K))
    b2 = jax.random.normal(kb2, (Cout2,), dtype=jnp.float32) * 0.1
    ref2 = conv_relu_reference(x2, w2, b2)

    out2_f32 = jax.block_until_ready(
        conv_relu(x2, w2, b2, tile_h=8, compute_dtype=jnp.float32))
    if not bool(jnp.allclose(out2_f32, ref2, atol=2e-3, rtol=2e-3)):
        raise AssertionError("folded-K f32 ConvRelu does not match reference")

    out2_bf16 = jax.block_until_ready(conv_relu(x2, w2, b2))
    if not bool(jnp.allclose(out2_bf16, ref2, atol=5e-2, rtol=5e-2)):
        raise AssertionError("folded-K bf16 ConvRelu does not match reference")

    print("KERNEL_OK")
</pallas_src>

<mosaic_0001>
module attributes {stable_mosaic.version = 11 : i64} {
  func.func @conv3x3_relu_kernel(%arg0: i32, %arg1: i32, %arg2: memref<1x6x18x4xf32, #tpu.memory_space<vmem>>, %arg3: memref<1x2x18x4xf32, #tpu.memory_space<vmem>>, %arg4: memref<3x3x4x8xf32, #tpu.memory_space<vmem>>, %arg5: memref<1x8xf32, #tpu.memory_space<vmem>>, %arg6: memref<1x6x16x8xf32, #tpu.memory_space<vmem>>) attributes {dimension_semantics = [#tpu.dimension_semantics<parallel>, #tpu.dimension_semantics<parallel>], iteration_bounds = array<i64: 2, 3>, scalar_prefetch = 0 : i64, scratch_operands = 0 : i64, tpu.core_type = #tpu.core_type<tc>, window_params = [{transform_indices = @transform_0, window_bounds = array<i64: 1, 6, 18, 4>}, {transform_indices = @transform_1, window_bounds = array<i64: 1, 2, 18, 4>}, {pipeline_mode = #tpu.pipeline_mode<synchronous>, transform_indices = @transform_2, window_bounds = array<i64: 3, 3, 4, 8>}, {pipeline_mode = #tpu.pipeline_mode<synchronous>, transform_indices = @transform_3, window_bounds = array<i64: 1, 8>}, {transform_indices = @transform_4, window_bounds = array<i64: 1, 6, 16, 8>}]} {
    %c0 = arith.constant 0 : index
    %c0_0 = arith.constant 0 : index
    %c0_1 = arith.constant 0 : index
    %c0_2 = arith.constant 0 : index
    %0 = vector.load %arg2[%c0, %c0_0, %c0_1, %c0_2] : memref<1x6x18x4xf32, #tpu.memory_space<vmem>>, vector<1x6x16x4xf32>
    %1 = vector.shape_cast %0 : vector<1x6x16x4xf32> to vector<6x16x4xf32>
    %c0_3 = arith.constant 0 : index
    %c0_4 = arith.constant 0 : index
    %c0_5 = arith.constant 0 : index
    %c0_6 = arith.constant 0 : index
    %2 = vector.load %arg3[%c0_3, %c0_4, %c0_5, %c0_6] : memref<1x2x18x4xf32, #tpu.memory_space<vmem>>, vector<1x2x16x4xf32>
    %3 = vector.shape_cast %2 : vector<1x2x16x4xf32> to vector<2x16x4xf32>
    %4 = tpu.concatenate %1, %3 in 0 : vector<6x16x4xf32>, vector<2x16x4xf32> -> vector<8x16x4xf32>
    %5 = vector.extract_strided_slice %4 {offsets = [0, 0, 0], sizes = [6, 16, 4], strides = [1, 1, 1]} : vector<8x16x4xf32> to vector<6x16x4xf32>
    %6 = vector.shape_cast %5 : vector<6x16x4xf32> to vector<96x4xf32>
    %c0_7 = arith.constant 0 : index
    %c0_8 = arith.constant 0 : index
    %c0_9 = arith.constant 0 : index
    %c0_10 = arith.constant 0 : index
    %7 = vector.load %arg4[%c0_7, %c0_8, %c0_9, %c0_10] : memref<3x3x4x8xf32, #tpu.memory_space<vmem>>, vector<1x1x4x8xf32>
    %8 = vector.shape_cast %7 : vector<1x1x4x8xf32> to vector<4x8xf32>
    %cst = arith.constant dense<0.000000e+00> : vector<96x8xf32>
    %9 = tpu.matmul %6, %8, %cst {dimension_numbers = #tpu.dot_dimension_numbers<[1], [0], [0], [1], [0, 0, 1, 1], [], []>} : vector<96x4xf32>, vector<4x8xf32>, vector<96x8xf32> -> vector<96x8xf32>
    %10 = vector.extract_strided_slice %4 {offsets = [1, 0, 0], sizes = [6, 16, 4], strides = [1, 1, 1]} : vector<8x16x4xf32> to vector<6x16x4xf32>
    %11 = vector.shape_cast %10 : vector<6x16x4xf32> to vector<96x4xf32>
    %c1 = arith.constant 1 : index
    %c0_11 = arith.constant 0 : index
    %c0_12 = arith.constant 0 : index
    %c0_13 = arith.constant 0 : index
    %12 = vector.load %arg4[%c1, %c0_11, %c0_12, %c0_13] : memref<3x3x4x8xf32, #tpu.memory_space<vmem>>, vector<1x1x4x8xf32>
    %13 = vector.shape_cast %12 : vector<1x1x4x8xf32> to vector<4x8xf32>
    %cst_14 = arith.constant dense<0.000000e+00> : vector<96x8xf32>
    %14 = tpu.matmul %11, %13, %cst_14 {dimension_numbers = #tpu.dot_dimension_numbers<[1], [0], [0], [1], [0, 0, 1, 1], [], []>} : vector<96x4xf32>, vector<4x8xf32>, vector<96x8xf32> -> vector<96x8xf32>
    %15 = arith.addf %9, %14 : vector<96x8xf32>
    %16 = vector.extract_strided_slice %4 {offsets = [2, 0, 0], sizes = [6, 16, 4], strides = [1, 1, 1]} : vector<8x16x4xf32> to vector<6x16x4xf32>
    %17 = vector.shape_cast %16 : vector<6x16x4xf32> to vector<96x4xf32>
    %c2 = arith.constant 2 : index
    %c0_15 = arith.constant 0 : index
    %c0_16 = arith.constant 0 : index
    %c0_17 = arith.constant 0 : index
    %18 = vector.load %arg4[%c2, %c0_15, %c0_16, %c0_17] : memref<3x3x4x8xf32, #tpu.memory_space<vmem>>, vector<1x1x4x8xf32>
    %19 = vector.shape_cast %18 : vector<1x1x4x8xf32> to vector<4x8xf32>
    %cst_18 = arith.constant dense<0.000000e+00> : vector<96x8xf32>
    %20 = tpu.matmul %17, %19, %cst_18 {dimension_numbers = #tpu.dot_dimension_numbers<[1], [0], [0], [1], [0, 0, 1, 1], [], []>} : vector<96x4xf32>, vector<4x8xf32>, vector<96x8xf32> -> vector<96x8xf32>
    %21 = arith.addf %15, %20 : vector<96x8xf32>
    %c0_19 = arith.constant 0 : index
    %c0_20 = arith.constant 0 : index
    %c1_21 = arith.constant 1 : index
    %c0_22 = arith.constant 0 : index
    %22 = vector.load %arg2[%c0_19, %c0_20, %c1_21, %c0_22] : memref<1x6x18x4xf32, #tpu.memory_space<vmem>>, vector<1x6x16x4xf32>
    %23 = vector.shape_cast %22 : vector<1x6x16x4xf32> to vector<6x16x4xf32>
    %c0_23 = arith.constant 0 : index
    %c0_24 = arith.constant 0 : index
    %c1_25 = arith.constant 1 : index
    %c0_26 = arith.constant 0 : index
    %24 = vector.load %arg3[%c0_23, %c0_24, %c1_25, %c0_26] : memref<1x2x18x4xf32, #tpu.memory_space<vmem>>, vector<1x2x16x4xf32>
    %25 = vector.shape_cast %24 : vector<1x2x16x4xf32> to vector<2x16x4xf32>
    %26 = tpu.concatenate %23, %25 in 0 : vector<6x16x4xf32>, vector<2x16x4xf32> -> vector<8x16x4xf32>
    %27 = vector.extract_strided_slice %26 {offsets = [0, 0, 0], sizes = [6, 16, 4], strides = [1, 1, 1]} : vector<8x16x4xf32> to vector<6x16x4xf32>
    %28 = vector.shape_cast %27 : vector<6x16x4xf32> to vector<96x4xf32>
    %c0_27 = arith.constant 0 : index
    %c1_28 = arith.constant 1 : index
    %c0_29 = arith.constant 0 : index
    %c0_30 = arith.constant 0 : index
    %29 = vector.load %arg4[%c0_27, %c1_28, %c0_29, %c0_30] : memref<3x3x4x8xf32, #tpu.memory_space<vmem>>, vector<1x1x4x8xf32>
    %30 = vector.shape_cast %29 : vector<1x1x4x8xf32> to vector<4x8xf32>
    %cst_31 = arith.constant dense<0.000000e+00> : vector<96x8xf32>
    %31 = tpu.matmul %28, %30, %cst_31 {dimension_numbers = #tpu.dot_dimension_numbers<[1], [0], [0], [1], [0, 0, 1, 1], [], []>} : vector<96x4xf32>, vector<4x8xf32>, vector<96x8xf32> -> vector<96x8xf32>
    %32 = arith.addf %21, %31 : vector<96x8xf32>
    %33 = vector.extract_strided_slice %26 {offsets = [1, 0, 0], sizes = [6, 16, 4], strides = [1, 1, 1]} : vector<8x16x4xf32> to vector<6x16x4xf32>
    %34 = vector.shape_cast %33 : vector<6x16x4xf32> to vector<96x4xf32>
    %c1_32 = arith.constant 1 : index
    %c1_33 = arith.constant 1 : index
    %c0_34 = arith.constant 0 : index
    %c0_35 = arith.constant 0 : index
    %35 = vector.load %arg4[%c1_32, %c1_33, %c0_34, %c0_35] : memref<3x3x4x8xf32, #tpu.memory_space<vmem>>, vector<1x1x4x8xf32>
    %36 = vector.shape_cast %35 : vector<1x1x4x8xf32> to vector<4x8xf32>
    %cst_36 = arith.constant dense<0.000000e+00> : vector<96x8xf32>
    %37 = tpu.matmul %34, %36, %cst_36 {dimension_numbers = #tpu.dot_dimension_numbers<[1], [0], [0], [1], [0, 0, 1, 1], [], []>} : vector<96x4xf32>, vector<4x8xf32>, vector<96x8xf32> -> vector<96x8xf32>
    %38 = arith.addf %32, %37 : vector<96x8xf32>
    %39 = vector.extract_strided_slice %26 {offsets = [2, 0, 0], sizes = [6, 16, 4], strides = [1, 1, 1]} : vector<8x16x4xf32> to vector<6x16x4xf32>
    %40 = vector.shape_cast %39 : vector<6x16x4xf32> to vector<96x4xf32>
    %c2_37 = arith.constant 2 : index
    %c1_38 = arith.constant 1 : index
    %c0_39 = arith.constant 0 : index
    %c0_40 = arith.constant 0 : index
    %41 = vector.load %arg4[%c2_37, %c1_38, %c0_39, %c0_40] : memref<3x3x4x8xf32, #tpu.memory_space<vmem>>, vector<1x1x4x8xf32>
    %42 = vector.shape_cast %41 : vector<1x1x4x8xf32> to vector<4x8xf32>
    %cst_41 = arith.constant dense<0.000000e+00> : vector<96x8xf32>
    %43 = tpu.matmul %40, %42, %cst_41 {dimension_numbers = #tpu.dot_dimension_numbers<[1], [0], [0], [1], [0, 0, 1, 1], [], []>} : vector<96x4xf32>, vector<4x8xf32>, vector<96x8xf32> -> vector<96x8xf32>
    %44 = arith.addf %38, %43 : vector<96x8xf32>
    %c0_42 = arith.constant 0 : index
    %c0_43 = arith.constant 0 : index
    %c2_44 = arith.constant 2 : index
    %c0_45 = arith.constant 0 : index
    %45 = vector.load %arg2[%c0_42, %c0_43, %c2_44, %c0_45] : memref<1x6x18x4xf32, #tpu.memory_space<vmem>>, vector<1x6x16x4xf32>
    %46 = vector.shape_cast %45 : vector<1x6x16x4xf32> to vector<6x16x4xf32>
    %c0_46 = arith.constant 0 : index
    %c0_47 = arith.constant 0 : index
    %c2_48 = arith.constant 2 : index
    %c0_49 = arith.constant 0 : index
    %47 = vector.load %arg3[%c0_46, %c0_47, %c2_48, %c0_49] : memref<1x2x18x4xf32, #tpu.memory_space<vmem>>, vector<1x2x16x4xf32>
    %48 = vector.shape_cast %47 : vector<1x2x16x4xf32> to vector<2x16x4xf32>
    %49 = tpu.concatenate %46, %48 in 0 : vector<6x16x4xf32>, vector<2x16x4xf32> -> vector<8x16x4xf32>
    %50 = vector.extract_strided_slice %49 {offsets = [0, 0, 0], sizes = [6, 16, 4], strides = [1, 1, 1]} : vector<8x16x4xf32> to vector<6x16x4xf32>
    %51 = vector.shape_cast %50 : vector<6x16x4xf32> to vector<96x4xf32>
    %c0_50 = arith.constant 0 : index
    %c2_51 = arith.constant 2 : index
    %c0_52 = arith.constant 0 : index
    %c0_53 = arith.constant 0 : index
    %52 = vector.load %arg4[%c0_50, %c2_51, %c0_52, %c0_53] : memref<3x3x4x8xf32, #tpu.memory_space<vmem>>, vector<1x1x4x8xf32>
    %53 = vector.shape_cast %52 : vector<1x1x4x8xf32> to vector<4x8xf32>
    %cst_54 = arith.constant dense<0.000000e+00> : vector<96x8xf32>
    %54 = tpu.matmul %51, %53, %cst_54 {dimension_numbers = #tpu.dot_dimension_numbers<[1], [0], [0], [1], [0, 0, 1, 1], [], []>} : vector<96x4xf32>, vector<4x8xf32>, vector<96x8xf32> -> vector<96x8xf32>
    %55 = arith.addf %44, %54 : vector<96x8xf32>
    %56 = vector.extract_strided_slice %49 {offsets = [1, 0, 0], sizes = [6, 16, 4], strides = [1, 1, 1]} : vector<8x16x4xf32> to vector<6x16x4xf32>
    %57 = vector.shape_cast %56 : vector<6x16x4xf32> to vector<96x4xf32>
    %c1_55 = arith.constant 1 : index
    %c2_56 = arith.constant 2 : index
    %c0_57 = arith.constant 0 : index
    %c0_58 = arith.constant 0 : index
    %58 = vector.load %arg4[%c1_55, %c2_56, %c0_57, %c0_58] : memref<3x3x4x8xf32, #tpu.memory_space<vmem>>, vector<1x1x4x8xf32>
    %59 = vector.shape_cast %58 : vector<1x1x4x8xf32> to vector<4x8xf32>
    %cst_59 = arith.constant dense<0.000000e+00> : vector<96x8xf32>
    %60 = tpu.matmul %57, %59, %cst_59 {dimension_numbers = #tpu.dot_dimension_numbers<[1], [0], [0], [1], [0, 0, 1, 1], [], []>} : vector<96x4xf32>, vector<4x8xf32>, vector<96x8xf32> -> vector<96x8xf32>
    %61 = arith.addf %55, %60 : vector<96x8xf32>
    %62 = vector.extract_strided_slice %49 {offsets = [2, 0, 0], sizes = [6, 16, 4], strides = [1, 1, 1]} : vector<8x16x4xf32> to vector<6x16x4xf32>
    %63 = vector.shape_cast %62 : vector<6x16x4xf32> to vector<96x4xf32>
    %c2_60 = arith.constant 2 : index
    %c2_61 = arith.constant 2 : index
    %c0_62 = arith.constant 0 : index
    %c0_63 = arith.constant 0 : index
    %64 = vector.load %arg4[%c2_60, %c2_61, %c0_62, %c0_63] : memref<3x3x4x8xf32, #tpu.memory_space<vmem>>, vector<1x1x4x8xf32>
    %65 = vector.shape_cast %64 : vector<1x1x4x8xf32> to vector<4x8xf32>
    %cst_64 = arith.constant dense<0.000000e+00> : vector<96x8xf32>
    %66 = tpu.matmul %63, %65, %cst_64 {dimension_numbers = #tpu.dot_dimension_numbers<[1], [0], [0], [1], [0, 0, 1, 1], [], []>} : vector<96x4xf32>, vector<4x8xf32>, vector<96x8xf32> -> vector<96x8xf32>
    %67 = arith.addf %61, %66 : vector<96x8xf32>
    %c0_65 = arith.constant 0 : index
    %c0_66 = arith.constant 0 : index
    %68 = vector.load %arg5[%c0_65, %c0_66] : memref<1x8xf32, #tpu.memory_space<vmem>>, vector<1x8xf32>
    %69 = vector.broadcast %68 : vector<1x8xf32> to vector<96x8xf32>
    %70 = arith.addf %67, %69 : vector<96x8xf32>
    %cst_67 = arith.constant 0.000000e+00 : f32
    %71 = vector.broadcast %cst_67 : f32 to vector<96x8xf32>
    %72 = arith.maximumf %70, %71 : vector<96x8xf32>
    %73 = vector.shape_cast %72 : vector<96x8xf32> to vector<6x16x8xf32>
    %c0_68 = arith.constant 0 : index
    %c0_69 = arith.constant 0 : index
    %c0_70 = arith.constant 0 : index
    %c0_71 = arith.constant 0 : index
    %74 = vector.load %arg6[%c0_68, %c0_69, %c0_70, %c0_71] : memref<1x6x16x8xf32, #tpu.memory_space<vmem>>, vector<1x6x16x8xf32>
    %75 = vector.shape_cast %74 : vector<1x6x16x8xf32> to vector<6x16x8xf32>
    %76 = vector.shape_cast %73 : vector<6x16x8xf32> to vector<1x6x16x8xf32>
    tpu.vector_store %arg6[%c0_68, %c0_69, %c0_70, %c0_71], %76 {strides = array<i32>} : memref<1x6x16x8xf32, #tpu.memory_space<vmem>>, vector<1x6x16x8xf32>,
    return
  }
  func.func @transform_0(%arg0: i32, %arg1: i32) -> (i32, i32, i32, i32) {
    %c0_i32 = arith.constant 0 : i32
    %c0_i32_0 = arith.constant 0 : i32
    %c0_i32_1 = arith.constant 0 : i32
    return %arg0, %arg1, %c0_i32, %c0_i32_0 : i32, i32, i32, i32
  }
  func.func @transform_1(%arg0: i32, %arg1: i32) -> (i32, i32, i32, i32) {
    %c1_i32 = arith.constant 1 : i32
    %0 = arith.addi %arg1, %c1_i32 : i32
    %c3_i32 = arith.constant 3 : i32
    %1 = arith.muli %0, %c3_i32 : i32
    %c0_i32 = arith.constant 0 : i32
    %c0_i32_0 = arith.constant 0 : i32
    %c0_i32_1 = arith.constant 0 : i32
    return %arg0, %1, %c0_i32, %c0_i32_0 : i32, i32, i32, i32
  }
  func.func @transform_2(%arg0: i32, %arg1: i32) -> (i32, i32, i32, i32) {
    %c0_i32 = arith.constant 0 : i32
    %c0_i32_0 = arith.constant 0 : i32
    %c0_i32_1 = arith.constant 0 : i32
    %c0_i32_2 = arith.constant 0 : i32
    %c0_i32_3 = arith.constant 0 : i32
    return %c0_i32, %c0_i32_0, %c0_i32_1, %c0_i32_2 : i32, i32, i32, i32
  }
  func.func @transform_3(%arg0: i32, %arg1: i32) -> (i32, i32) {
    %c0_i32 = arith.constant 0 : i32
    %c0_i32_0 = arith.constant 0 : i32
    %c0_i32_1 = arith.constant 0 : i32
    return %c0_i32, %c0_i32_0 : i32, i32
  }
  func.func @transform_4(%arg0: i32, %arg1: i32) -> (i32, i32, i32, i32) {
    %c0_i32 = arith.constant 0 : i32
    %c0_i32_0 = arith.constant 0 : i32
    %c0_i32_1 = arith.constant 0 : i32
    return %arg0, %arg1, %c0_i32, %c0_i32_0 : i32, i32, i32, i32
  }
}

</mosaic_0001>

<bundles_post_ra>
// kernel: tpu_custom_call.1
= control target key start
LH: loop header
LB: loop body
LE: loop exit
PB: predicated region body
PF: predicated region fallthrough
CT: control target
= control target key end

     0   :  { %s2573_s15 = smov 0   ;;  %s2575_s16 = smov 0   ;;  %s3013_s0 = inlined_call_operand.vmem [shape: f32[2,20,18,4], index: 0, kind: input, shape index: {}]   ;;  %s3014_s1 = inlined_call_operand.vmem [shape: f32[2,20,18,4], index: 1, kind: input, shape index: {}]   ;;  %s3015_s2 = inlined_call_operand.vmem [shape: f32[3,3,4,8], index: 2, kind: input, shape index: {}]   ;;  %s3016_s3 = inlined_call_operand.vmem [shape: f32[1,8], index: 3, kind: input, shape index: {}]   ;;  %s3017_s4 = inlined_call_operand.vmem [shape: f32[2,18,16,8], index: 4, kind: output, shape index: {}]  }
   0x1   :  { %s2577_s17 = smov 0   ;;  %s2579_s18 = smov 0  }
   0x2   :  { %s2581_s19 = smov 0  }
   0x3 LB: > { %s23_s20 = sadd.s32 1, %s2538_s17  ;;  %s26_s21 = sadd.s32 1, %s2542_s18  ;;  %s2546_s19 = sphi %s2581_s19, %s14_s19   ;;  %s2542_s18 = sphi %s2579_s18, %s3021_s18   ;;  %s2538_s17 = sphi %s2577_s17, %s3020_s17   ;;  %s2534_s16 = sphi %s2575_s16, %s3019_s16   ;;  %s2530_s15 = sphi %s2573_s15, %s3018_s15  }
   0x4   : > { %p24_p0 = scmp.ge.s32.totalorder %s23_s20, 3  ;;  %p1935_p1 = scmp.ge.s32.totalorder %s2546_s19, 1 }
   0x5   : > { %p220_p2 = scmp.lt.s32.totalorder %s2546_s19, 7 }
   0x6   : > { %s3023_s20 = smov (%p24_p0, %s23_s20), 0  ;;  %s3025_s21 = smov (!%p24_p0, %s26_s21), %s2542_s18 }
   0x7   : > { %p221_p3 = pnand %p1935_p1, %p220_p2  ;;  %p28_p4 = scmp.ge.s32.totalorder %s3025_s21, 2 }
   0x8   : > { %v1941_v0 = vld [vmem:[%s3015_s2 + $0xc] sm:$0xf] (!%p221_p3)  ;;  %vm376_vm0 = vcmask (!%p221_p3), 1043456   ;;  %v2611_v1 = vld [vmem:[%s3015_s2 + $0x10] sm:$0xf] (!%p221_p3)  ;;  %s2614_s26 = smul.u32 (!%p221_p3), 6, %s2530_s15 }
   0x9   : > { %s3027_s21 = smov (%p28_p4, %s3025_s21), 0  ;;  %224 = sbr.rel (%p221_p3) target bundleno = 351 (0x15f), region = 36 }
   0xa   : > { %2186 = vmatprep.subr.msk.mxu1 (!%p221_p3), %vm376_vm0, %v1941_v0  ;;  %2266 = vmatprep.subr.msk.mxu0 (!%p221_p3), %vm376_vm0, %v2611_v1  ;;  %p279_p5 = scmp.lt.s32.totalorder (!%p221_p3), %s2534_s16, 1  ;;  %v336_v2 = vld [vmem:[%s3015_s2] sm:$0xf] (!%p221_p3)  ;;  %v2010_v3 = vld [vmem:[%s3015_s2 + $0x1c] sm:$0xf] (!%p221_p3)  ;;  %p281_p6 = scmp.lt.s32.totalorder (!%p221_p3), %s2614_s26, 19 }
   0xb   : > { %2187 = vmatpush3.msk.msra.mxu1 (!%p221_p3), %vm376_vm0, %v1941_v0  ;;  %2267 = vmatpush3.msk.msra.mxu0 (!%p221_p3), %vm376_vm0, %v2611_v1  ;;  %s294_s5 = sadd.s32 (!%p221_p3), 1, %s2530_s15  ;;  %vm339_vm1 = vcmask (!%p221_p3), 31744   ;;  %v2024_v10 = vld [vmem:[%s3015_s2 + $0x8] sm:$0xf] (!%p221_p3)  ;;  %v1968_v11 = vld [vmem:[%s3015_s2 + $0x18] sm:$0xf] (!%p221_p3) }
   0xc   : > { %2206 = vmatprep.subr.msk.mxu1 (!%p221_p3), %vm376_vm0, %v336_v2  ;;  %2286 = vmatprep.subr.msk.mxu0 (!%p221_p3), %vm376_vm0, %v2010_v3  ;;  %s1937_s9 = smul.u32 (!%p221_p3), 6, %s294_s5  ;;  %v2038_v21 = vld [vmem:[%s3015_s2 + $0x14] sm:$0xf] (!%p221_p3)  ;;  %v1982_v32 = vld [vmem:[%s3015_s2 + $0x4] sm:$0xf] (!%p221_p3)  ;;  %p312_p8 = scmp.lt.s32.totalorder (!%p221_p3), %s2614_s26, 17 }
   0xd   : > { %v2052_v39 = vld [vmem:[%s3015_s2 + $0x20] sm:$0xf] (!%p221_p3)  ;;  %vm1798_vm2 = vcmask (!%p221_p3), 64512  }
   0xe   : > { %p299_p7 = scmp.lt.s32.totalorder (!%p221_p3), %s1937_s9, 19  ;;  %v2955_v0 = vld [vmem:[%s3016_s3] ss:$0 sm:$0xff] (!%p221_p3) }
  0x10   : > { %s3029_s16 = smov (!%p279_p5, %s2534_s16), 1  ;;  %s3031_s9 = smov (!%p299_p7, %s1937_s9), 19 }
  0x11   : > { %s282_s6 = scalar_select %p281_p6, %s2614_s26, 19 }
  0x12   : > { %s2465_s7 = smul.u32 60, %s3029_s16  ;;  %s3033_s26 = smov (!%p312_p8, %s2614_s26), 17 }
  0x13   : > { %s2464_s8 = smul.u32 3, %s282_s6  ;;  %s1939_s13 = sshll.u32 %s3033_s26, 1 }
  0x14   : > { %s2466_s25 = smul.u32 3, %s3031_s9 }
  0x15   : > { %s285_s10 = sadd.s32 %s2465_s7, %s2464_s8  ;;  %s2467_s12 = smul.u32 36, %s3029_s16 }
  0x16   : > { %s1936_s11 = sshll.u32 %s285_s10, 3  ;;  %s303_s27 = sadd.s32 %s2466_s25, %s2465_s7 }
  0x17   : > { %s2641_s14 = scalar_lea.vmem %s3013_s0, %s1936_s11  ;;  %s1938_s28 = sshll.u32 %s303_s27, 3 }
  0x18   : > { %v2644_v4 = vld [vmem:[%s2641_s14 + $0x18] sm:$0xff]  ;;  %v2650_v6 = vld [vmem:[%s2641_s14 + $0x20] sm:$0xff]  ;;  %v2660_v8 = vld [vmem:[%s2641_s14 + $0x30] sm:$0xff]  ;;  %s2731_s5 = scalar_lea.vmem %s3014_s1, %s1938_s28 }
  0x19   : > { %v2647_v5 = vld [vmem:[%s2641_s14 + $0x19] sm:$0xff]  ;;  %2188 = vmatprep.mubr.msk.f32.mxu1 %vm339_vm1, %v2644_v4  ;;  %v2657_v7 = vld [vmem:[%s2641_s14 + $0x21] sm:$0xff]  ;;  %v2663_v9 = vld [vmem:[%s2641_s14 + $0x31] sm:$0xff] }
  0x1a   : > { %2268 = vmatprep.mubr.msk.f32.mxu0 %vm339_vm1, %v2647_v5  ;;  %2189 = vmatmul.mubr.msk.f32.vlgmr.msra.gmra.mrb[0].mxu1 %vm339_vm1, %v2650_v6  ;;  %v2678_v12 = vld [vmem:[%s2641_s14 + $0x38] sm:$0xff]  ;;  %v2688_v14 = vld [vmem:[%s2641_s14 + $0x48] sm:$0xff]  ;;  %v2704_v16 = vld [vmem:[%s2641_s14 + $0x50] sm:$0xff] }
  0x1b   : > { %2269 = vmatmul.mubr.msk.f32.vlgmr.msra.gmra.mrb[0].mxu0 %vm339_vm1, %v2657_v7  ;;  %2207 = vmatpush3.msk.msra.mxu1 %vm376_vm0, %v336_v2  ;;  %v2681_v13 = vld [vmem:[%s2641_s14 + $0x39] sm:$0xff]  ;;  %v2691_v15 = vld [vmem:[%s2641_s14 + $0x49] sm:$0xff]  ;;  %v2707_v17 = vld [vmem:[%s2641_s14 + $0x51] sm:$0xff] }
  0x1c   : > { %2287 = vmatpush3.msk.msra.mxu0 %vm376_vm0, %v2010_v3  ;;  %2191 = vmatprep.mubr.msk.f32.mxu1 %vm339_vm1, %v2660_v8  ;;  %v2712_v18 = vld [vmem:[%s2641_s14 + $0x60] sm:$0xff]  ;;  %v2723_v19 = vld [vmem:[%s2641_s14 + $0x68] sm:$0xff]  ;;  %v2726_v20 = vld [vmem:[%s2641_s14 + $0x78] sm:$0xff] }
  0x1d   : > { %2271 = vmatprep.mubr.msk.f32.mxu0 %vm339_vm1, %v2663_v9  ;;  %2306 = vmatprep.subr.msk.mxu0 %vm376_vm0, %v2024_v10  ;;  %v2744_v22 = vld [vmem:[%s2641_s14 + $0x80] sm:$0xff]  ;;  %v2764_v25 = vld [vmem:[%s2731_s5 + $0x8] sm:$0xff]  ;;  %v1281_v41 = vld [vmem:[%s2641_s14 + $0x32] sm:$0xff] }
  0x1e   : > { %2226 = vmatprep.subr.msk.mxu1 %vm376_vm0, %v1968_v11  ;;  %2192 = vmatmul.mubr.msk.f32.gmra.mrb[2].mxu1 %vm339_vm1, %v2678_v12  ;;  %v2749_v23 = vld [vmem:[%s2731_s5] sm:$0xff]  ;;  %v2767_v26 = vld [vmem:[%s2641_s14 + $0x69] sm:$0xff]  ;;  %v1284_v44 = vld [vmem:[%s2641_s14 + $0x52] sm:$0xff] }
  0x1f   : > { %2272 = vmatmul.mubr.msk.f32.gmra.mrb[2].mxu0 %vm339_vm1, %v2681_v13  ;;  %2194 = vmatprep.mubr.msk.f32.mxu1 %vm339_vm1, %v2688_v14  ;;  %v2752_v24 = vld [vmem:[%s2641_s14 + $0x61] sm:$0xff]  ;;  %v2771_v28 = vld [vmem:[%s2641_s14 + $0x79] sm:$0xff]  ;;  %v2797_v33 = vld [vmem:[%s2731_s5 + $0x9] sm:$0xff] }
  0x20   : > { %2274 = vmatprep.mubr.msk.f32.mxu0 %vm339_vm1, %v2691_v15  ;;  %v320_v27 = vld [vmem:[%s2641_s14] sm:$0xff]  ;;  %v321_v29 = vld [vmem:[%s2641_s14 + $0x8] sm:$0xff]  ;;  %v334_v49 = vld [vmem:[%s2731_s5 + $0x18] sm:$0xff] }
  0x21   : > { %v2782_v30 = vld [vmem:[%s2641_s14 + $0x81] sm:$0xff]  ;;  %v801_v34 = vld [vmem:[%s2731_s5 + $0x19] sm:$0xff]  ;;  %v1278_v37 = vld [vmem:[%s2641_s14 + $0xa] sm:$0xff] }
  0x22   : > { %2195 = vmatmul.mubr.msk.f32.gmra.mrb[4].mxu1 %vm339_vm1, %v2704_v16  ;;  %v2785_v31 = vld [vmem:[%s2731_s5 + $0x1] sm:$0xff]  ;;  %v1283_v43 = vld [vmem:[%s2641_s14 + $0x4a] sm:$0xff] }
  0x23   : > { %2275 = vmatmul.mubr.msk.f32.gmra.mrb[4].mxu0 %vm339_vm1, %v2707_v17  ;;  %2197 = vmatprep.mubr.msk.f32.mxu1 %vm339_vm1, %v2712_v18  ;;  %v802_v35 = vld [vmem:[%s2731_s5 + $0x21] sm:$0xff]  ;;  %v1286_v46 = vld [vmem:[%s2641_s14 + $0x6a] sm:$0xff] }
  0x24   : > { %2288 = vmatprep.mubr.msk.f32.mxu0 %vm339_vm1, %v2663_v9  ;;  %v1277_v36 = vld [vmem:[%s2641_s14 + $0x2] sm:$0xff]  ;;  %v1279_v38 = vld [vmem:[%s2641_s14 + $0x1a] sm:$0xff]  ;;  %v1290_v54 = vld [vmem:[%s2731_s5 + $0xa] sm:$0xff] }
  0x25   : > { %v1280_v40 = vld [vmem:[%s2641_s14 + $0x22] sm:$0xff]  ;;  %v1282_v42 = vld [vmem:[%s2641_s14 + $0x3a] sm:$0xff] }
  0x26   : > { %2198 = vmatmul.mubr.msk.f32.gmra.mrb[6].mxu1 %vm339_vm1, %v2723_v19  ;;  %v1285_v45 = vld [vmem:[%s2641_s14 + $0x62] sm:$0xff]  ;;  %v1287_v47 = vld [vmem:[%s2641_s14 + $0x7a] sm:$0xff] }
  0x27   : > { %2289 = vmatmul.mubr.msk.f32.vlgmr.msra.gmra.mrb[0].mxu0 %vm339_vm1, %v2681_v13  ;;  %2200 = vmatprep.mubr.msk.f32.mxu1 %vm339_vm1, %v2726_v20  ;;  %v1288_v48 = vld [vmem:[%s2641_s14 + $0x82] sm:$0xff]  ;;  %v1291_v55 = vld [vmem:[%s2731_s5 + $0x1a] sm:$0xff] }
  0x28   : > { %2307 = vmatpush3.msk.msra.mxu0 %vm376_vm0, %v2024_v10  ;;  %2291 = vmatprep.mubr.msk.f32.mxu0 %vm339_vm1, %v2691_v15  ;;  %v335_v50 = vld [vmem:[%s2731_s5 + $0x20] sm:$0xff]  ;;  %v788_v52 = vld [vmem:[%s2641_s14 + $0x9] sm:$0xff] }
  0x29   : > { %2326 = vmatprep.subr.msk.mxu0 %vm376_vm0, %v2038_v21  ;;  %v787_v51 = vld [vmem:[%s2641_s14 + $0x1] sm:$0xff]  ;;  %s316_s14 = sadd.s32 %s2467_s12, %s1939_s13 }
  0x2a   : > { %2201 = vmatmul.mubr.msk.f32.gmra.mrb[8].mxu1 %vm339_vm1, %v2744_v22  ;;  %v1289_v53 = vld [vmem:[%s2731_s5 + $0x2] sm:$0xff]  ;;  %s1940_s23 = sshll.u32 %s316_s14, 3 }
  0x2b   : > { %2292 = vmatmul.mubr.msk.f32.gmra.mrb[2].mxu0 %vm339_vm1, %v2707_v17  ;;  %2203 = vmatprep.mubr.msk.f32.mxu1 %vm339_vm1, %v2749_v23  ;;  %v1292_v56 = vld [vmem:[%s2731_s5 + $0x22] sm:$0xff]  ;;  %s2961_s16 = scalar_lea.vmem %s3017_s4, %s1940_s23 }
  0x2c   : > { %2294 = vmatprep.mubr.msk.f32.mxu0 %vm339_vm1, %v2752_v24 }
  0x2e   : > { %2204 = vmatmul.mubr.msk.f32.gmra.mrb[10].mxu1 %vm339_vm1, %v2764_v25 }
  0x2f   : > { %2295 = vmatmul.mubr.msk.f32.gmra.mrb[4].mxu0 %vm339_vm1, %v2767_v26  ;;  %2208 = vmatprep.mubr.msk.f32.mxu1 %vm339_vm1, %v320_v27 }
  0x30   : > { %2297 = vmatprep.mubr.msk.f32.mxu0 %vm339_vm1, %v2771_v28 }
  0x32   : > { %2209 = vmatmul.mubr.msk.f32.vlgmr.msra.gmra.mrb[0].mxu1 %vm339_vm1, %v321_v29 }
  0x33   : > { %2298 = vmatmul.mubr.msk.f32.gmra.mrb[6].mxu0 %vm339_vm1, %v2782_v30  ;;  %2227 = vmatpush3.msk.msra.mxu1 %vm376_vm0, %v1968_v11 }
  0x34   : > { %2211 = vmatprep.mubr.msk.f32.mxu1 %vm339_vm1, %v2644_v4  ;;  %2300 = vmatprep.mubr.msk.f32.mxu0 %vm339_vm1, %v2785_v31 }
  0x35   : > { %2246 = vmatprep.subr.msk.mxu1 %vm376_vm0, %v1982_v32 }
  0x36   : > { %2212 = vmatmul.mubr.msk.f32.gmra.mrb[2].mxu1 %vm339_vm1, %v2650_v6 }
  0x37   : > { %2301 = vmatmul.mubr.msk.f32.gmra.mrb[8].mxu0 %vm339_vm1, %v2797_v33  ;;  %2214 = vmatprep.mubr.msk.f32.mxu1 %vm339_vm1, %v2660_v8 }
  0x38   : > { %2303 = vmatprep.mubr.msk.f32.mxu0 %vm339_vm1, %v801_v34 }
  0x3a   : > { %2215 = vmatmul.mubr.msk.f32.gmra.mrb[4].mxu1 %vm339_vm1, %v2678_v12 }
  0x3b   : > { %2304 = vmatmul.mubr.msk.f32.gmra.mrb[10].mxu0 %vm339_vm1, %v802_v35  ;;  %2217 = vmatprep.mubr.msk.f32.mxu1 %vm339_vm1, %v2688_v14 }
  0x3c   : > { %2308 = vmatprep.mubr.msk.f32.mxu0 %vm339_vm1, %v1277_v36 }
  0x3e   : > { %2218 = vmatmul.mubr.msk.f32.gmra.mrb[6].mxu1 %vm339_vm1, %v2704_v16 }
  0x3f   : > { %2309 = vmatmul.mubr.msk.f32.vlgmr.msra.gmra.mrb[0].mxu0 %vm339_vm1, %v1278_v37  ;;  %2220 = vmatprep.mubr.msk.f32.mxu1 %vm339_vm1, %v2712_v18 }
  0x40   : > { %2327 = vmatpush3.msk.msra.mxu0 %vm376_vm0, %v2038_v21  ;;  %2311 = vmatprep.mubr.msk.f32.mxu0 %vm339_vm1, %v1279_v38 }
  0x41   : > { %2346 = vmatprep.subr.msk.mxu0 %vm376_vm0, %v2052_v39 }
  0x42   : > { %2221 = vmatmul.mubr.msk.f32.gmra.mrb[8].mxu1 %vm339_vm1, %v2723_v19 }
  0x43   : > { %2312 = vmatmul.mubr.msk.f32.gmra.mrb[2].mxu0 %vm339_vm1, %v1280_v40  ;;  %2223 = vmatprep.mubr.msk.f32.mxu1 %vm339_vm1, %v2726_v20 }
  0x44   : > { %2314 = vmatprep.mubr.msk.f32.mxu0 %vm339_vm1, %v1281_v41 }
  0x46   : > { %2224 = vmatmul.mubr.msk.f32.gmra.mrb[10].mxu1 %vm339_vm1, %v2744_v22 }
  0x47   : > { %2315 = vmatmul.mubr.msk.f32.gmra.mrb[4].mxu0 %vm339_vm1, %v1282_v42  ;;  %2228 = vmatprep.mubr.msk.f32.mxu1 %vm339_vm1, %v2660_v8 }
  0x48   : > { %2317 = vmatprep.mubr.msk.f32.mxu0 %vm339_vm1, %v1283_v43 }
  0x4a   : > { %2229 = vmatmul.mubr.msk.f32.vlgmr.msra.gmra.mrb[0].mxu1 %vm339_vm1, %v2678_v12 }
  0x4b   : > { %2318 = vmatmul.mubr.msk.f32.gmra.mrb[6].mxu0 %vm339_vm1, %v1284_v44  ;;  %2247 = vmatpush3.msk.msra.mxu1 %vm376_vm0, %v1982_v32 }
  0x4c   : > { %2231 = vmatprep.mubr.msk.f32.mxu1 %vm339_vm1, %v2688_v14  ;;  %2320 = vmatprep.mubr.msk.f32.mxu0 %vm339_vm1, %v1285_v45 }
  0x4d   : > { %2366 = vmatprep.subr.msk.mxu1 %vm376_vm0, %v2611_v1 }
  0x4e   : > { %2232 = vmatmul.mubr.msk.f32.gmra.mrb[2].mxu1 %vm339_vm1, %v2704_v16 }
  0x4f   : > { %2321 = vmatmul.mubr.msk.f32.gmra.mrb[8].mxu0 %vm339_vm1, %v1286_v46  ;;  %2234 = vmatprep.mubr.msk.f32.mxu1 %vm339_vm1, %v2712_v18 }
  0x50   : > { %2323 = vmatprep.mubr.msk.f32.mxu0 %vm339_vm1, %v1287_v47 }
  0x52   : > { %2235 = vmatmul.mubr.msk.f32.gmra.mrb[4].mxu1 %vm339_vm1, %v2723_v19 }
  0x53   : > { %2324 = vmatmul.mubr.msk.f32.gmra.mrb[10].mxu0 %vm339_vm1, %v1288_v48  ;;  %2237 = vmatprep.mubr.msk.f32.mxu1 %vm339_vm1, %v2726_v20 }
  0x54   : > { %2328 = vmatprep.mubr.msk.f32.mxu0 %vm339_vm1, %v1279_v38 }
  0x56   : > { %2238 = vmatmul.mubr.msk.f32.gmra.mrb[6].mxu1 %vm339_vm1, %v2744_v22 }
  0x57   : > { %2329 = vmatmul.mubr.msk.f32.vlgmr.msra.gmra.mrb[0].mxu0 %vm339_vm1, %v1280_v40  ;;  %2240 = vmatprep.mubr.msk.f32.mxu1 %vm339_vm1, %v2749_v23 }
  0x58   : > { %2347 = vmatpush3.msk.msra.mxu0 %vm376_vm0, %v2052_v39  ;;  %2331 = vmatprep.mubr.msk.f32.mxu0 %vm339_vm1, %v1281_v41 }
  0x5a   : > { %2241 = vmatmul.mubr.msk.f32.gmra.mrb[8].mxu1 %vm339_vm1, %v2764_v25 }
  0x5b   : > { %2332 = vmatmul.mubr.msk.f32.gmra.mrb[2].mxu0 %vm339_vm1, %v1282_v42  ;;  %2243 = vmatprep.mubr.msk.f32.mxu1 %vm339_vm1, %v334_v49 }
  0x5c   : > { %2334 = vmatprep.mubr.msk.f32.mxu0 %vm339_vm1, %v1283_v43 }
  0x5e   : > { %2244 = vmatmul.mubr.msk.f32.gmra.mrb[10].mxu1 %vm339_vm1, %v335_v50 }
  0x5f   : > { %2335 = vmatmul.mubr.msk.f32.gmra.mrb[4].mxu0 %vm339_vm1, %v1284_v44  ;;  %2248 = vmatprep.mubr.msk.f32.mxu1 %vm339_vm1, %v787_v51 }
  0x60   : > { %2337 = vmatprep.mubr.msk.f32.mxu0 %vm339_vm1, %v1285_v45 }
  0x62   : > { %2249 = vmatmul.mubr.msk.f32.vlgmr.msra.gmra.mrb[0].mxu1 %vm339_vm1, %v788_v52 }
  0x63   : > { %2338 = vmatmul.mubr.msk.f32.gmra.mrb[6].mxu0 %vm339_vm1, %v1286_v46  ;;  %2367 = vmatpush3.msk.msra.mxu1 %vm376_vm0, %v2611_v1 }
  0x64   : > { %2251 = vmatprep.mubr.msk.f32.mxu1 %vm339_vm1, %v2647_v5  ;;  %2340 = vmatprep.mubr.msk.f32.mxu0 %vm339_vm1, %v1287_v47 }
  0x66   : > { %2252 = vmatmul.mubr.msk.f32.gmra.mrb[2].mxu1 %vm339_vm1, %v2657_v7 }
  0x67   : > { %2341 = vmatmul.mubr.msk.f32.gmra.mrb[8].mxu0 %vm339_vm1, %v1288_v48  ;;  %2254 = vmatprep.mubr.msk.f32.mxu1 %vm339_vm1, %v2663_v9 }
  0x68   : > { %2343 = vmatprep.mubr.msk.f32.mxu0 %vm339_vm1, %v1289_v53 }
  0x6a   : > { %2255 = vmatmul.mubr.msk.f32.gmra.mrb[4].mxu1 %vm339_vm1, %v2681_v13 }
  0x6b   : > { %2344 = vmatmul.mubr.msk.f32.gmra.mrb[10].mxu0 %vm339_vm1, %v1290_v54  ;;  %2257 = vmatprep.mubr.msk.f32.mxu1 %vm339_vm1, %v2691_v15 }
  0x6c   : > { %2348 = vmatprep.mubr.msk.f32.mxu0 %vm339_vm1, %v1281_v41 }
  0x6e   : > { %2258 = vmatmul.mubr.msk.f32.gmra.mrb[6].mxu1 %vm339_vm1, %v2707_v17 }
  0x6f   : > { %2349 = vmatmul.mubr.msk.f32.vlgmr.msra.gmra.mrb[0].mxu0 %vm339_vm1, %v1282_v42  ;;  %2260 = vmatprep.mubr.msk.f32.mxu1 %vm339_vm1, %v2752_v24 }
  0x70   : > { %2351 = vmatprep.mubr.msk.f32.mxu0 %vm339_vm1, %v1283_v43 }
  0x72   : > { %2261 = vmatmul.mubr.msk.f32.gmra.mrb[8].mxu1 %vm339_vm1, %v2767_v26 }
  0x73   : > { %2352 = vmatmul.mubr.msk.f32.gmra.mrb[2].mxu0 %vm339_vm1, %v1284_v44  ;;  %2263 = vmatprep.mubr.msk.f32.mxu1 %vm339_vm1, %v2771_v28 }
  0x74   : > { %2354 = vmatprep.mubr.msk.f32.mxu0 %vm339_vm1, %v1285_v45 }
  0x76   : > { %2264 = vmatmul.mubr.msk.f32.gmra.mrb[10].mxu1 %vm339_vm1, %v2782_v30 }
  0x77   : > { %2355 = vmatmul.mubr.msk.f32.gmra.mrb[4].mxu0 %vm339_vm1, %v1286_v46  ;;  %2277 = vmatprep.mubr.msk.f32.mxu1 %vm339_vm1, %v2752_v24 }
  0x78   : > { %2357 = vmatprep.mubr.msk.f32.mxu0 %vm339_vm1, %v1287_v47 }
  0x7a   : > { %2278 = vmatmul.mubr.msk.f32.vlgmr.msra.gmra.mrb[6].mxu1 %vm339_vm1, %v2767_v26 }
  0x7b   : > { %2358 = vmatmul.mubr.msk.f32.gmra.mrb[6].mxu0 %vm339_vm1, %v1288_v48  ;;  %2280 = vmatprep.mubr.msk.f32.mxu1 %vm339_vm1, %v2771_v28 }
  0x7c   : > { %2360 = vmatprep.mubr.msk.f32.mxu0 %vm339_vm1, %v1289_v53 }
  0x7e   : > { %2281 = vmatmul.mubr.msk.f32.gmra.mrb[8].mxu1 %vm339_vm1, %v2782_v30 }
  0x7f   : > { %2361 = vmatmul.mubr.msk.f32.gmra.mrb[8].mxu0 %vm339_vm1, %v1290_v54  ;;  %2283 = vmatprep.mubr.msk.f32.mxu1 %vm339_vm1, %v2785_v31 }
  0x80   : > { %2363 = vmatprep.mubr.msk.f32.mxu0 %vm339_vm1, %v1291_v55 }
  0x82   : > { %2284 = vmatmul.mubr.msk.f32.gmra.mrb[10].mxu1 %vm339_vm1, %v2797_v33 }
  0x83   : > { %2364 = vmatmul.mubr.msk.f32.gmra.mrb[10].mxu0 %vm339_vm1, %v1292_v56 }
 0x135   : > { %v2250_v57 = vpop.f32.mrb[0].mxu1 }
 0x136   : > { %v910_v58 = vpop.f32.mrb[1].mxu1 }
 0x139   : > { %v2253_v59 = vpop.f32.mrb[2].mxu1 }
 0x13a   : > { %v920_v60 = vpop.f32.mrb[3].mxu1 }
 0x13d   : > { %v2256_v61 = vpop.f32.mrb[4].mxu1 }
 0x13e   : > { %v930_v62 = vpop.f32.mrb[5].mxu1 }
 0x142   : > { %v2350_v63 = vpop.f32.mrb[0].mxu0 }
 0x143   : > { %v2368_v1 = vadd.f32 %v2350_v63, %v2250_v57  ;;  %v1696_v2 = vpop.f32.mrb[1].mxu0 }
 0x144   : > { %v2369_v3 = vadd.f32 %v1696_v2, %v910_v58 }
 0x145   : > { %v1775_v4 = vadd.f32 %v2368_v1, %v2955_v0 }
 0x146   : > { %v1774_v5 = vadd.f32 %v2369_v3, %v2955_v0  ;;  %v2353_v6 = vpop.f32.mrb[2].mxu0 }
 0x147   : > { %v1787_v7 = vmax.f32 %v1775_v4, 0.0  ;;  %v2370_v8 = vadd.f32 %v2353_v6, %v2253_v59  ;;  %v1706_v9 = vpop.f32.mrb[3].mxu0 }
 0x148   : > { %v1786_v10 = vmax.f32 %v1774_v5, 0.0  ;;  %v2371_v11 = vadd.f32 %v1706_v9, %v920_v60 }
 0x149   : > { %1800 = vst.msk [vmem:[%s2961_s16 + $0x8] sm:$0xff] %vm1798_vm2, %v1787_v7  ;;  %v1777_v12 = vadd.f32 %v2370_v8, %v2955_v0 }
 0x14a   : > { %1799 = vst.msk [vmem:[%s2961_s16] sm:$0xff] %vm1798_vm2, %v1786_v10  ;;  %v1776_v13 = vadd.f32 %v2371_v11, %v2955_v0  ;;  %v2356_v14 = vpop.f32.mrb[4].mxu0 }
 0x14b   : > { %v1789_v15 = vmax.f32 %v1777_v12, 0.0  ;;  %v2372_v16 = vadd.f32 %v2356_v14, %v2256_v61  ;;  %v1716_v17 = vpop.f32.mrb[5].mxu0 }
 0x14c   : > { %v1788_v18 = vmax.f32 %v1776_v13, 0.0  ;;  %v2373_v19 = vadd.f32 %v1716_v17, %v930_v62 }
 0x14d   : > { %1802 = vst.msk [vmem:[%s2961_s16 + $0x18] sm:$0xff] %vm1798_vm2, %v1789_v15  ;;  %v1779_v20 = vadd.f32 %v2372_v16, %v2955_v0  ;;  %v2279_v22 = vpop.f32.mrb[6].mxu1 }
 0x14e   : > { %1801 = vst.msk [vmem:[%s2961_s16 + $0x10] sm:$0xff] %vm1798_vm2, %v1788_v18  ;;  %v1778_v21 = vadd.f32 %v2373_v19, %v2955_v0  ;;  %v2359_v23 = vpop.f32.mrb[6].mxu0  ;;  %v1088_v26 = vpop.f32.mrb[7].mxu1 }
 0x14f   : > { %v1791_v24 = vmax.f32 %v1779_v20, 0.0  ;;  %v2374_v25 = vadd.f32 %v2359_v23, %v2279_v22  ;;  %v1726_v27 = vpop.f32.mrb[7].mxu0 }
 0x150   : > { %v1790_v28 = vmax.f32 %v1778_v21, 0.0  ;;  %v2375_v29 = vadd.f32 %v1726_v27, %v1088_v26 }
 0x151   : > { %1804 = vst.msk [vmem:[%s2961_s16 + $0x28] sm:$0xff] %vm1798_vm2, %v1791_v24  ;;  %v1781_v30 = vadd.f32 %v2374_v25, %v2955_v0  ;;  %v2282_v32 = vpop.f32.mrb[8].mxu1 }
 0x152   : > { %1803 = vst.msk [vmem:[%s2961_s16 + $0x20] sm:$0xff] %vm1798_vm2, %v1790_v28  ;;  %v1780_v31 = vadd.f32 %v2375_v29, %v2955_v0  ;;  %v2362_v33 = vpop.f32.mrb[8].mxu0  ;;  %v1098_v36 = vpop.f32.mrb[9].mxu1 }
 0x153   : > { %v1793_v34 = vmax.f32 %v1781_v30, 0.0  ;;  %v2376_v35 = vadd.f32 %v2362_v33, %v2282_v32  ;;  %v1736_v37 = vpop.f32.mrb[9].mxu0 }
 0x154   : > { %v1792_v38 = vmax.f32 %v1780_v31, 0.0  ;;  %v2377_v39 = vadd.f32 %v1736_v37, %v1098_v36 }
 0x155   : > { %1806 = vst.msk [vmem:[%s2961_s16 + $0x38] sm:$0xff] %vm1798_vm2, %v1793_v34  ;;  %v1783_v40 = vadd.f32 %v2376_v35, %v2955_v0  ;;  %v2285_v42 = vpop.f32.mrb[10].mxu1 }
 0x156   : > { %1805 = vst.msk [vmem:[%s2961_s16 + $0x30] sm:$0xff] %vm1798_vm2, %v1792_v38  ;;  %v1782_v41 = vadd.f32 %v2377_v39, %v2955_v0  ;;  %v2365_v43 = vpop.f32.mrb[10].mxu0  ;;  %v1108_v46 = vpop.f32.mrb[11].mxu1 }
 0x157   : > { %v1795_v44 = vmax.f32 %v1783_v40, 0.0  ;;  %v2378_v45 = vadd.f32 %v2365_v43, %v2285_v42  ;;  %v1746_v47 = vpop.f32.mrb[11].mxu0 }
 0x158   : > { %v1794_v48 = vmax.f32 %v1782_v41, 0.0  ;;  %v2379_v49 = vadd.f32 %v1746_v47, %v1108_v46 }
 0x159   : > { %1808 = vst.msk [vmem:[%s2961_s16 + $0x48] sm:$0xff] %vm1798_vm2, %v1795_v44  ;;  %v1785_v50 = vadd.f32 %v2378_v45, %v2955_v0 }
 0x15a   : > { %1807 = vst.msk [vmem:[%s2961_s16 + $0x40] sm:$0xff] %vm1798_vm2, %v1794_v48  ;;  %v1784_v51 = vadd.f32 %v2379_v49, %v2955_v0 }
 0x15b   : > { %v1797_v52 = vmax.f32 %v1785_v50, 0.0 }
 0x15c   : > { %v1796_v53 = vmax.f32 %v1784_v51, 0.0 }
 0x15d   : > { %1810 = vst.msk [vmem:[%s2961_s16 + $0x58] sm:$0xff] %vm1798_vm2, %v1797_v52 }
 0x15e   : > { %1809 = vst.msk [vmem:[%s2961_s16 + $0x50] sm:$0xff] %vm1798_vm2, %v1796_v53 }
 0x15f PF: > { %s14_s19 = sadd.s32 1, %s2546_s19   ;;  %s3018_s15 = smov %s2538_s17 }
 0x160   : > { %p11_p9 = scmp.ge.s32.totalorder %s14_s19, 8   ;;  %s3019_s16 = smov %s2542_s18 }
 0x161   : > { %s3020_s17 = smov %s3023_s20  ;;  %s3021_s18 = smov %s3027_s21 }
 0x162   :  { %13 = sbr.rel (!%p11_p9) target bundleno = 3 (0x3), region = 77 }

</bundles_post_ra>
